<compile_context>
chip_gen: v6e
topology: v6e:2x2x1
jax: 0.10.0
libtpu: 0.0.40
codegen_flags: <defaults>
</compile_context>

<pallas_src>
import jax
import jax.numpy as jnp
import numpy as np
from jax.experimental import pallas as pl
from jax.experimental.pallas import tpu as pltpu


# -----------------------------------------------------------------------------
# Pallas kernel: fused BiLSTM recurrence + mean pool + linear1/relu + linear2/sigmoid
# -----------------------------------------------------------------------------
def cbilstm_kernel(x_ref,        # (T*N, 2E) bf16: rows are [x_t | x_{T-1-t}] per (t, n)
                   wih_ref,      # (2E, 8H)  bf16 block-diag input weights, sigmoid-gates-first
                   b_ref,        # (1, 8H)   f32 folded LSTM biases (bih + bhh), both dirs
                   whh_ref,      # (2H, 8H)  f32 block-diag recurrent weights
                   w1a_ref,      # (H, hidden) linear1 weights, forward half
                   w1b_ref,      # (H, hidden) linear1 weights, backward half
                   b1_ref,       # (1, hidden)
                   w2_ref,       # (1, hidden) linear2 weight row
                   b2_ref,       # (1, 1)
                   out_ref,      # (1, T) lane-dense output
                   xp_scr,       # (T*N, 8H) f32 hoisted input projections
                   pool_scr):    # (T, 2H)   f32 per-step batch-sum [fwd | bwd]
    TN = x_ref.shape[0]
    H8 = wih_ref.shape[1]
    H = H8 // 8
    H2 = 2 * H
    T = pool_scr.shape[0]
    N = TN // T

    # ---- hoisted input projection: one big MXU matmul (bf16 in, f32 acc) -----
    xp_scr[...] = (jnp.dot(x_ref[...], wih_ref[...],
                           preferred_element_type=jnp.float32)
                   + b_ref[...])

    whh = whh_ref[...]             # loop-invariant: load once

    # ---- fused bidirectional recurrence (fully unrolled) ---------------------
    def step(t, carry):
        hs, cs = carry                                        # (N, 2H) each, f32
        row = pl.multiple_of(t * N, N)
        g = xp_scr[pl.ds(row, N), :] + jnp.dot(
            hs, whh, preferred_element_type=jnp.float32)      # (N, 8H)
        # gate columns: [i_f,i_b, f_f,f_b, o_f,o_b, g_f,g_b] ->
        # ONE wide sigmoid over the first 6H lanes, ONE tanh over the last 2H.
        sig = jax.nn.sigmoid(g[:, :6 * H])                    # (N, 6H)
        tg = jnp.tanh(g[:, 6 * H:])                           # (N, 2H)
        i_g = sig[:, 0 * H2:1 * H2]
        f_g = sig[:, 1 * H2:2 * H2]
        o_g = sig[:, 2 * H2:3 * H2]
        cs = f_g * cs + i_g * tg
        hs = o_g * jnp.tanh(cs)
        # single (1, 2H) batch-sum store per step; time re-ordering of the
        # backward half is done once after the loop, off the serial chain.
        pool_scr[pl.ds(t, 1), :] = jnp.sum(hs, axis=0, keepdims=True)
        return hs, cs

    zero = jnp.zeros((N, H2), jnp.float32)
    jax.lax.fori_loop(0, T, step, (zero, zero), unroll=True)

    # ---- mean pool + backward time reversal + MLP head -----------------------
    pooled = pool_scr[...] * (1.0 / N)                        # (T, 2H) batch mean
    pf = pooled[:, :H]                                        # fwd half, already time-ordered
    # backward half at step t belongs to original time T-1-t: reverse once via
    # a tiny reversal-permutation matmul (no per-step masked stores / gathers).
    r = jax.lax.broadcasted_iota(jnp.int32, (T, T), 0)
    c = jax.lax.broadcasted_iota(jnp.int32, (T, T), 1)
    rev = jnp.where(r + c == T - 1, 1.0, 0.0).astype(jnp.float32)
    pb = jnp.dot(rev, pooled[:, H:], preferred_element_type=jnp.float32)  # (T, H)

    hid = jnp.maximum(
        jnp.dot(pf, w1a_ref[...], preferred_element_type=jnp.float32)
        + jnp.dot(pb, w1b_ref[...], preferred_element_type=jnp.float32)
        + b1_ref[...],
        0.0)                                                  # (T, hidden)
    # lane-dense (1, T) output: w2_row @ hid.T
    logit = (jnp.dot(w2_ref[...], hid.T, preferred_element_type=jnp.float32)
             + b2_ref[...])                                   # (1, T)
    out_ref[...] = jax.nn.sigmoid(logit)


# -----------------------------------------------------------------------------
# One-time fused weight construction (hoisted out of the per-call hot path)
# -----------------------------------------------------------------------------
def _fused_weight_blocks(p, H, E):
    """Block-diagonal fused BiLSTM weights, sigmoid gates first.

    Column layout (width H each): [i_f, i_b, f_f, f_b, o_f, o_b, g_f, g_b].
    Rows of wih_blk: [0:E] -> forward input, [E:2E] -> (time-reversed) backward input.
    Rows of whh_blk: [0:H] -> h_fwd, [H:2H] -> h_bwd.
    """
    zE = jnp.zeros((E, H), jnp.float32)
    zH = jnp.zeros((H, H), jnp.float32)
    bf = p["bih_f"] + p["bhh_f"]
    bb = p["bih_b"] + p["bhh_b"]
    # PyTorch gate row order is i(0), f(1), g(2), o(3); emit i, f, o, g so the
    # three sigmoid gates are contiguous and tanh's g gate is last.
    gate_order = (0, 1, 3, 2)
    wih_cols, whh_cols, b_cols = [], [], []
    for k in gate_order:
        sl = slice(k * H, (k + 1) * H)
        wih_cols.append(jnp.concatenate([p["wih_f"][sl].T, zE], axis=0))
        wih_cols.append(jnp.concatenate([zE, p["wih_b"][sl].T], axis=0))
        whh_cols.append(jnp.concatenate([p["whh_f"][sl].T, zH], axis=0))
        whh_cols.append(jnp.concatenate([zH, p["whh_b"][sl].T], axis=0))
        b_cols.append(bf[sl])
        b_cols.append(bb[sl])
    wih_blk = jnp.concatenate(wih_cols, axis=1).astype(jnp.bfloat16)  # (2E, 8H)
    whh_blk = jnp.concatenate(whh_cols, axis=1)                       # (2H, 8H) f32
    b_blk = jnp.concatenate(b_cols).reshape(1, 8 * H)                 # (1, 8H) f32
    return wih_blk, whh_blk, b_blk


def prepare_fused_params(p):
    """Build kernel-ready fused weights ONCE (model-load time, not per forward)."""
    H = p["whh_f"].shape[1]
    E = p["wih_f"].shape[1]
    hidden = p["W1"].shape[0]
    wih_blk, whh_blk, b_blk = _fused_weight_blocks(p, H, E)
    return dict(
        embedding=p["embedding"],
        wih=wih_blk, whh=whh_blk, b=b_blk,
        w1a=p["W1"][:, :H].T, w1b=p["W1"][:, H:].T,
        b1=p["b1"].reshape(1, hidden),
        w2=p["W2"].reshape(1, hidden),
        b2=p["b2"].reshape(1, 1),
    )


# -----------------------------------------------------------------------------
# Wrapper: embedding lookup + pallas_call (hot path only)
# -----------------------------------------------------------------------------
def _cbilstm_forward_impl(input_ids, f):
    emb = jnp.take(f["embedding"], input_ids, axis=0).astype(jnp.float32)  # (T, N, E)
    # dropout: identity (eval mode)
    T, N, E = emb.shape
    H = f["whh"].shape[0] // 2
    hidden = f["b1"].shape[1]

    # [x_t | x_{T-1-t}] so one matmul covers both directions' input projections.
    # bf16 halves the DMA bytes of the largest input; accumulation stays f32.
    x_cat = jnp.concatenate([emb, emb[::-1]], axis=-1).reshape(
        T * N, 2 * E).astype(jnp.bfloat16)

    args = (
        x_cat, f["wih"], f["b"], f["whh"],
        f["w1a"], f["w1b"], f["b1"], f["w2"], f["b2"],
    )

    out = pl.pallas_call(
        cbilstm_kernel,
        out_shape=jax.ShapeDtypeStruct((1, T), jnp.float32),
        in_specs=[pl.BlockSpec(memory_space=pltpu.MemorySpace.VMEM)] * len(args),
        out_specs=pl.BlockSpec(memory_space=pltpu.MemorySpace.VMEM),
        scratch_shapes=[
            pltpu.VMEM((T * N, 8 * H), jnp.float32),   # hoisted input projections
            pltpu.VMEM((T, 2 * H), jnp.float32),       # merged per-step batch sums
        ],
        # TODO(synk): re-derive per generation for the streamed version
        # (<= ~48-56 MiB on v7x's 64 MiB VMEM, larger on v5e/v6e).
        compiler_params=pltpu.CompilerParams(vmem_limit_bytes=32 * 1024 * 1024),
    )(*args)
    return out[0]   # (T,)  — torch .squeeze(1)


cbilstm_forward = jax.jit(_cbilstm_forward_impl)


# -----------------------------------------------------------------------------
# Pure-JAX reference (for correctness check)
# -----------------------------------------------------------------------------
def cbilstm_reference(input_ids, p):
    emb = jnp.take(p["embedding"], input_ids, axis=0).astype(jnp.float32)  # (T, N, E)
    H = p["whh_f"].shape[1]
    N = emb.shape[1]

    def run_dir(x, wih, whh, bih, bhh):
        def step(carry, x_t):
            h, c = carry
            g = x_t @ wih.T + h @ whh.T + bih + bhh
            i, f, gg, o = jnp.split(g, 4, axis=-1)
            i = jax.nn.sigmoid(i)
            f = jax.nn.sigmoid(f)
            gg = jnp.tanh(gg)
            o = jax.nn.sigmoid(o)
            c = f * c + i * gg
            h = o * jnp.tanh(c)
            return (h, c), h

        h0 = jnp.zeros((N, H), jnp.float32)
        c0 = jnp.zeros((N, H), jnp.float32)
        _, hs = jax.lax.scan(step, (h0, c0), x)
        return hs

    hf = run_dir(emb, p["wih_f"], p["whh_f"], p["bih_f"], p["bhh_f"])
    hb = run_dir(emb[::-1], p["wih_b"], p["whh_b"], p["bih_b"], p["bhh_b"])[::-1]
    out = jnp.concatenate([hf, hb], axis=-1)          # (T, N, 2H)
    pooled = jnp.mean(out, axis=1)                    # (T, 2H)
    hid = jax.nn.relu(pooled @ p["W1"].T + p["b1"])
    return jax.nn.sigmoid(hid @ p["W2"].T + p["b2"])[:, 0]


# -----------------------------------------------------------------------------
# Deterministic parameter init (shapes from __init__)
# -----------------------------------------------------------------------------
def init_params(key, vocab_size, E, H, hidden, padding_index):
    ks = jax.random.split(key, 13)
    emb = jax.random.normal(ks[0], (vocab_size, E), jnp.float32) * 0.1
    emb = emb.at[padding_index].set(0.0)              # padding_idx row is zero

    lim = 1.0 / np.sqrt(H)
    u = lambda k, s: jax.random.uniform(k, s, jnp.float32, -lim, lim)
    p = dict(
        embedding=emb,
        wih_f=u(ks[1], (4 * H, E)), whh_f=u(ks[2], (4 * H, H)),
        bih_f=u(ks[3], (4 * H,)),   bhh_f=u(ks[4], (4 * H,)),
        wih_b=u(ks[5], (4 * H, E)), whh_b=u(ks[6], (4 * H, H)),
        bih_b=u(ks[7], (4 * H,)),   bhh_b=u(ks[8], (4 * H,)),
    )
    lim1 = 1.0 / np.sqrt(2 * H)
    p["W1"] = jax.random.uniform(ks[9], (hidden, 2 * H), jnp.float32, -lim1, lim1)
    p["b1"] = jax.random.uniform(ks[10], (hidden,), jnp.float32, -lim1, lim1)
    lim2 = 1.0 / np.sqrt(hidden)
    p["W2"] = jax.random.uniform(ks[11], (1, hidden), jnp.float32, -lim2, lim2)
    p["b2"] = jax.random.uniform(ks[12], (1,), jnp.float32, -lim2, lim2)
    return p


if __name__ == "__main__":
    vocab_size, embedding_dim, rnn_size, hidden_size, padding_index = 32, 16, 16, 32, 0
    T, N = 4, 16   # input_ids shape: (T, N) — see layout comment above

    key = jax.random.PRNGKey(0)
    k_params, k_ids = jax.random.split(key)
    params = init_params(k_params, vocab_size, embedding_dim, rnn_size,
                         hidden_size, padding_index)
    input_ids = jax.random.randint(k_ids, (T, N), 0, vocab_size, dtype=jnp.int32)

    fused = jax.tree_util.tree_map(jax.block_until_ready,
                                   prepare_fused_params(params))  # one-time prep

    out = jax.block_until_ready(cbilstm_forward(input_ids, fused))
    ref = jax.block_until_ready(cbilstm_reference(input_ids, params))

    assert out.shape == (T,), out.shape
    # bf16 input-projection operands (f32 accumulate) -> slightly looser tol.
    np.testing.assert_allclose(np.asarray(out), np.asarray(ref), rtol=5e-3, atol=5e-3)
    print("KERNEL_OK")
</pallas_src>

<mosaic_0001>
module attributes {stable_mosaic.version = 11 : i64} {
  func.func @cbilstm_kernel(%arg0: memref<64x32xbf16, #tpu.memory_space<vmem>>, %arg1: memref<32x128xbf16, #tpu.memory_space<vmem>>, %arg2: memref<1x128xf32, #tpu.memory_space<vmem>>, %arg3: memref<32x128xf32, #tpu.memory_space<vmem>>, %arg4: memref<16x32xf32, #tpu.memory_space<vmem>>, %arg5: memref<16x32xf32, #tpu.memory_space<vmem>>, %arg6: memref<1x32xf32, #tpu.memory_space<vmem>>, %arg7: memref<1x32xf32, #tpu.memory_space<vmem>>, %arg8: memref<1x1xf32, #tpu.memory_space<vmem>>, %arg9: memref<1x4xf32, #tpu.memory_space<vmem>>, %arg10: memref<64x128xf32, #tpu.memory_space<vmem>>, %arg11: memref<4x32xf32, #tpu.memory_space<vmem>>) attributes {dimension_semantics = [], scalar_prefetch = 0 : i64, scratch_operands = 2 : i64, tpu.core_type = #tpu.core_type<tc>} {
    %c0 = arith.constant 0 : index
    %c0_0 = arith.constant 0 : index
    %0 = vector.load %arg0[%c0, %c0_0] : memref<64x32xbf16, #tpu.memory_space<vmem>>, vector<64x32xbf16>
    %c0_1 = arith.constant 0 : index
    %c0_2 = arith.constant 0 : index
    %1 = vector.load %arg1[%c0_1, %c0_2] : memref<32x128xbf16, #tpu.memory_space<vmem>>, vector<32x128xbf16>
    %cst = arith.constant dense<0.000000e+00> : vector<64x128xf32>
    %2 = tpu.matmul %0, %1, %cst {dimension_numbers = #tpu.dot_dimension_numbers<[1], [0], [0], [1], [0, 0, 1, 1], [], []>} : vector<64x32xbf16>, vector<32x128xbf16>, vector<64x128xf32> -> vector<64x128xf32>
    %c0_3 = arith.constant 0 : index
    %c0_4 = arith.constant 0 : index
    %3 = vector.load %arg2[%c0_3, %c0_4] : memref<1x128xf32, #tpu.memory_space<vmem>>, vector<1x128xf32>
    %4 = vector.broadcast %3 : vector<1x128xf32> to vector<64x128xf32>
    %5 = arith.addf %2, %4 : vector<64x128xf32>
    %c0_5 = arith.constant 0 : index
    %c0_6 = arith.constant 0 : index
    %6 = vector.load %arg10[%c0_5, %c0_6] : memref<64x128xf32, #tpu.memory_space<vmem>>, vector<64x128xf32>
    tpu.vector_store %arg10[%c0_5, %c0_6], %5 {strides = array<i32>} : memref<64x128xf32, #tpu.memory_space<vmem>>, vector<64x128xf32>,
    %c0_7 = arith.constant 0 : index
    %c0_8 = arith.constant 0 : index
    %7 = vector.load %arg3[%c0_7, %c0_8] : memref<32x128xf32, #tpu.memory_space<vmem>>, vector<32x128xf32>
    %cst_9 = arith.constant 0.000000e+00 : f32
    %8 = vector.broadcast %cst_9 : f32 to vector<16x32xf32>
    %c0_i32 = arith.constant 0 : i32
    %c16_i32 = arith.constant 16 : i32
    %9 = arith.muli %c0_i32, %c16_i32 : i32
    %10 = tpu.assume_multiple %9, 16 : i32
    %11 = arith.index_cast %10 : i32 to index
    %c0_10 = arith.constant 0 : index
    %12 = vector.load %arg10[%11, %c0_10] : memref<64x128xf32, #tpu.memory_space<vmem>>, vector<16x128xf32>
    %cst_11 = arith.constant dense<0.000000e+00> : vector<16x128xf32>
    %13 = tpu.matmul %8, %7, %cst_11 {dimension_numbers = #tpu.dot_dimension_numbers<[1], [0], [0], [1], [0, 0, 1, 1], [], []>} : vector<16x32xf32>, vector<32x128xf32>, vector<16x128xf32> -> vector<16x128xf32>
    %14 = arith.addf %12, %13 : vector<16x128xf32>
    %15 = vector.extract_strided_slice %14 {offsets = [0, 0], sizes = [16, 96], strides = [1, 1]} : vector<16x128xf32> to vector<16x96xf32>
    %16 = arith.negf %15 : vector<16x96xf32>
    %17 = math.exp %16 : vector<16x96xf32>
    %cst_12 = arith.constant 1.000000e+00 : f32
    %18 = vector.broadcast %cst_12 : f32 to vector<16x96xf32>
    %19 = arith.addf %18, %17 : vector<16x96xf32>
    %20 = arith.divf %18, %19 : vector<16x96xf32>
    %21 = vector.extract_strided_slice %14 {offsets = [0, 96], sizes = [16, 32], strides = [1, 1]} : vector<16x128xf32> to vector<16x32xf32>
    %22 = math.tanh %21 : vector<16x32xf32>
    %23 = vector.extract_strided_slice %20 {offsets = [0, 0], sizes = [16, 32], strides = [1, 1]} : vector<16x96xf32> to vector<16x32xf32>
    %24 = vector.extract_strided_slice %20 {offsets = [0, 32], sizes = [16, 32], strides = [1, 1]} : vector<16x96xf32> to vector<16x32xf32>
    %25 = vector.extract_strided_slice %20 {offsets = [0, 64], sizes = [16, 32], strides = [1, 1]} : vector<16x96xf32> to vector<16x32xf32>
    %26 = arith.mulf %24, %8 : vector<16x32xf32>
    %27 = arith.mulf %23, %22 : vector<16x32xf32>
    %28 = arith.addf %26, %27 : vector<16x32xf32>
    %29 = math.tanh %28 : vector<16x32xf32>
    %30 = arith.mulf %25, %29 : vector<16x32xf32>
    %cst_13 = arith.constant dense<0.000000e+00> : vector<32xf32>
    %31 = vector.multi_reduction <add>, %30, %cst_13 [0] : vector<16x32xf32> to vector<32xf32>
    %32 = vector.shape_cast %31 : vector<32xf32> to vector<1x32xf32>
    %33 = arith.index_cast %c0_i32 : i32 to index
    %c0_14 = arith.constant 0 : index
    %34 = vector.load %arg11[%33, %c0_14] : memref<4x32xf32, #tpu.memory_space<vmem>>, vector<1x32xf32>
    tpu.vector_store %arg11[%33, %c0_14], %32 {strides = array<i32>} : memref<4x32xf32, #tpu.memory_space<vmem>>, vector<1x32xf32>,
    %c1_i32 = arith.constant 1 : i32
    %c16_i32_15 = arith.constant 16 : i32
    %35 = arith.muli %c1_i32, %c16_i32_15 : i32
    %36 = tpu.assume_multiple %35, 16 : i32
    %37 = arith.index_cast %36 : i32 to index
    %c0_16 = arith.constant 0 : index
    %38 = vector.load %arg10[%37, %c0_16] : memref<64x128xf32, #tpu.memory_space<vmem>>, vector<16x128xf32>
    %cst_17 = arith.constant dense<0.000000e+00> : vector<16x128xf32>
    %39 = tpu.matmul %30, %7, %cst_17 {dimension_numbers = #tpu.dot_dimension_numbers<[1], [0], [0], [1], [0, 0, 1, 1], [], []>} : vector<16x32xf32>, vector<32x128xf32>, vector<16x128xf32> -> vector<16x128xf32>
    %40 = arith.addf %38, %39 : vector<16x128xf32>
    %41 = vector.extract_strided_slice %40 {offsets = [0, 0], sizes = [16, 96], strides = [1, 1]} : vector<16x128xf32> to vector<16x96xf32>
    %42 = arith.negf %41 : vector<16x96xf32>
    %43 = math.exp %42 : vector<16x96xf32>
    %cst_18 = arith.constant 1.000000e+00 : f32
    %44 = vector.broadcast %cst_18 : f32 to vector<16x96xf32>
    %45 = arith.addf %44, %43 : vector<16x96xf32>
    %46 = arith.divf %44, %45 : vector<16x96xf32>
    %47 = vector.extract_strided_slice %40 {offsets = [0, 96], sizes = [16, 32], strides = [1, 1]} : vector<16x128xf32> to vector<16x32xf32>
    %48 = math.tanh %47 : vector<16x32xf32>
    %49 = vector.extract_strided_slice %46 {offsets = [0, 0], sizes = [16, 32], strides = [1, 1]} : vector<16x96xf32> to vector<16x32xf32>
    %50 = vector.extract_strided_slice %46 {offsets = [0, 32], sizes = [16, 32], strides = [1, 1]} : vector<16x96xf32> to vector<16x32xf32>
    %51 = vector.extract_strided_slice %46 {offsets = [0, 64], sizes = [16, 32], strides = [1, 1]} : vector<16x96xf32> to vector<16x32xf32>
    %52 = arith.mulf %50, %28 : vector<16x32xf32>
    %53 = arith.mulf %49, %48 : vector<16x32xf32>
    %54 = arith.addf %52, %53 : vector<16x32xf32>
    %55 = math.tanh %54 : vector<16x32xf32>
    %56 = arith.mulf %51, %55 : vector<16x32xf32>
    %cst_19 = arith.constant dense<0.000000e+00> : vector<32xf32>
    %57 = vector.multi_reduction <add>, %56, %cst_19 [0] : vector<16x32xf32> to vector<32xf32>
    %58 = vector.shape_cast %57 : vector<32xf32> to vector<1x32xf32>
    %59 = arith.index_cast %c1_i32 : i32 to index
    %c0_20 = arith.constant 0 : index
    %60 = vector.load %arg11[%59, %c0_20] : memref<4x32xf32, #tpu.memory_space<vmem>>, vector<1x32xf32>
    tpu.vector_store %arg11[%59, %c0_20], %58 {strides = array<i32>} : memref<4x32xf32, #tpu.memory_space<vmem>>, vector<1x32xf32>,
    %c2_i32 = arith.constant 2 : i32
    %c16_i32_21 = arith.constant 16 : i32
    %61 = arith.muli %c2_i32, %c16_i32_21 : i32
    %62 = tpu.assume_multiple %61, 16 : i32
    %63 = arith.index_cast %62 : i32 to index
    %c0_22 = arith.constant 0 : index
    %64 = vector.load %arg10[%63, %c0_22] : memref<64x128xf32, #tpu.memory_space<vmem>>, vector<16x128xf32>
    %cst_23 = arith.constant dense<0.000000e+00> : vector<16x128xf32>
    %65 = tpu.matmul %56, %7, %cst_23 {dimension_numbers = #tpu.dot_dimension_numbers<[1], [0], [0], [1], [0, 0, 1, 1], [], []>} : vector<16x32xf32>, vector<32x128xf32>, vector<16x128xf32> -> vector<16x128xf32>
    %66 = arith.addf %64, %65 : vector<16x128xf32>
    %67 = vector.extract_strided_slice %66 {offsets = [0, 0], sizes = [16, 96], strides = [1, 1]} : vector<16x128xf32> to vector<16x96xf32>
    %68 = arith.negf %67 : vector<16x96xf32>
    %69 = math.exp %68 : vector<16x96xf32>
    %cst_24 = arith.constant 1.000000e+00 : f32
    %70 = vector.broadcast %cst_24 : f32 to vector<16x96xf32>
    %71 = arith.addf %70, %69 : vector<16x96xf32>
    %72 = arith.divf %70, %71 : vector<16x96xf32>
    %73 = vector.extract_strided_slice %66 {offsets = [0, 96], sizes = [16, 32], strides = [1, 1]} : vector<16x128xf32> to vector<16x32xf32>
    %74 = math.tanh %73 : vector<16x32xf32>
    %75 = vector.extract_strided_slice %72 {offsets = [0, 0], sizes = [16, 32], strides = [1, 1]} : vector<16x96xf32> to vector<16x32xf32>
    %76 = vector.extract_strided_slice %72 {offsets = [0, 32], sizes = [16, 32], strides = [1, 1]} : vector<16x96xf32> to vector<16x32xf32>
    %77 = vector.extract_strided_slice %72 {offsets = [0, 64], sizes = [16, 32], strides = [1, 1]} : vector<16x96xf32> to vector<16x32xf32>
    %78 = arith.mulf %76, %54 : vector<16x32xf32>
    %79 = arith.mulf %75, %74 : vector<16x32xf32>
    %80 = arith.addf %78, %79 : vector<16x32xf32>
    %81 = math.tanh %80 : vector<16x32xf32>
    %82 = arith.mulf %77, %81 : vector<16x32xf32>
    %cst_25 = arith.constant dense<0.000000e+00> : vector<32xf32>
    %83 = vector.multi_reduction <add>, %82, %cst_25 [0] : vector<16x32xf32> to vector<32xf32>
    %84 = vector.shape_cast %83 : vector<32xf32> to vector<1x32xf32>
    %85 = arith.index_cast %c2_i32 : i32 to index
    %c0_26 = arith.constant 0 : index
    %86 = vector.load %arg11[%85, %c0_26] : memref<4x32xf32, #tpu.memory_space<vmem>>, vector<1x32xf32>
    tpu.vector_store %arg11[%85, %c0_26], %84 {strides = array<i32>} : memref<4x32xf32, #tpu.memory_space<vmem>>, vector<1x32xf32>,
    %c3_i32 = arith.constant 3 : i32
    %c16_i32_27 = arith.constant 16 : i32
    %87 = arith.muli %c3_i32, %c16_i32_27 : i32
    %88 = tpu.assume_multiple %87, 16 : i32
    %89 = arith.index_cast %88 : i32 to index
    %c0_28 = arith.constant 0 : index
    %90 = vector.load %arg10[%89, %c0_28] : memref<64x128xf32, #tpu.memory_space<vmem>>, vector<16x128xf32>
    %cst_29 = arith.constant dense<0.000000e+00> : vector<16x128xf32>
    %91 = tpu.matmul %82, %7, %cst_29 {dimension_numbers = #tpu.dot_dimension_numbers<[1], [0], [0], [1], [0, 0, 1, 1], [], []>} : vector<16x32xf32>, vector<32x128xf32>, vector<16x128xf32> -> vector<16x128xf32>
    %92 = arith.addf %90, %91 : vector<16x128xf32>
    %93 = vector.extract_strided_slice %92 {offsets = [0, 0], sizes = [16, 96], strides = [1, 1]} : vector<16x128xf32> to vector<16x96xf32>
    %94 = arith.negf %93 : vector<16x96xf32>
    %95 = math.exp %94 : vector<16x96xf32>
    %cst_30 = arith.constant 1.000000e+00 : f32
    %96 = vector.broadcast %cst_30 : f32 to vector<16x96xf32>
    %97 = arith.addf %96, %95 : vector<16x96xf32>
    %98 = arith.divf %96, %97 : vector<16x96xf32>
    %99 = vector.extract_strided_slice %92 {offsets = [0, 96], sizes = [16, 32], strides = [1, 1]} : vector<16x128xf32> to vector<16x32xf32>
    %100 = math.tanh %99 : vector<16x32xf32>
    %101 = vector.extract_strided_slice %98 {offsets = [0, 0], sizes = [16, 32], strides = [1, 1]} : vector<16x96xf32> to vector<16x32xf32>
    %102 = vector.extract_strided_slice %98 {offsets = [0, 32], sizes = [16, 32], strides = [1, 1]} : vector<16x96xf32> to vector<16x32xf32>
    %103 = vector.extract_strided_slice %98 {offsets = [0, 64], sizes = [16, 32], strides = [1, 1]} : vector<16x96xf32> to vector<16x32xf32>
    %104 = arith.mulf %102, %80 : vector<16x32xf32>
    %105 = arith.mulf %101, %100 : vector<16x32xf32>
    %106 = arith.addf %104, %105 : vector<16x32xf32>
    %107 = math.tanh %106 : vector<16x32xf32>
    %108 = arith.mulf %103, %107 : vector<16x32xf32>
    %cst_31 = arith.constant dense<0.000000e+00> : vector<32xf32>
    %109 = vector.multi_reduction <add>, %108, %cst_31 [0] : vector<16x32xf32> to vector<32xf32>
    %110 = vector.shape_cast %109 : vector<32xf32> to vector<1x32xf32>
    %111 = arith.index_cast %c3_i32 : i32 to index
    %c0_32 = arith.constant 0 : index
    %112 = vector.load %arg11[%111, %c0_32] : memref<4x32xf32, #tpu.memory_space<vmem>>, vector<1x32xf32>
    tpu.vector_store %arg11[%111, %c0_32], %110 {strides = array<i32>} : memref<4x32xf32, #tpu.memory_space<vmem>>, vector<1x32xf32>,
    %c4_i32 = arith.constant 4 : i32
    %c0_33 = arith.constant 0 : index
    %c0_34 = arith.constant 0 : index
    %113 = vector.load %arg11[%c0_33, %c0_34] : memref<4x32xf32, #tpu.memory_space<vmem>>, vector<4x32xf32>
    %cst_35 = arith.constant 6.250000e-02 : f32
    %114 = vector.broadcast %cst_35 : f32 to vector<4x32xf32>
    %115 = arith.mulf %113, %114 : vector<4x32xf32>
    %116 = vector.extract_strided_slice %115 {offsets = [0, 0], sizes = [4, 16], strides = [1, 1]} : vector<4x32xf32> to vector<4x16xf32>
    %117 = tpu.iota {dimensions = array<i32: 0>} : vector<4x4xi32>
    %118 = tpu.iota {dimensions = array<i32: 1>} : vector<4x4xi32>
    %119 = arith.addi %117, %118 : vector<4x4xi32>
    %c3_i32_36 = arith.constant 3 : i32
    %120 = vector.broadcast %c3_i32_36 : i32 to vector<4x4xi32>
    %121 = arith.cmpi eq, %119, %120 : vector<4x4xi32>
    %cst_37 = arith.constant 1.000000e+00 : f32
    %cst_38 = arith.constant 0.000000e+00 : f32
    %122 = vector.broadcast %cst_37 : f32 to vector<4x4xf32>
    %123 = vector.broadcast %cst_38 : f32 to vector<4x4xf32>
    %124 = arith.select %121, %122, %123 : vector<4x4xi1>, vector<4x4xf32>
    %125 = vector.extract_strided_slice %115 {offsets = [0, 16], sizes = [4, 16], strides = [1, 1]} : vector<4x32xf32> to vector<4x16xf32>
    %cst_39 = arith.constant dense<0.000000e+00> : vector<4x16xf32>
    %126 = tpu.matmul %124, %125, %cst_39 {dimension_numbers = #tpu.dot_dimension_numbers<[1], [0], [0], [1], [0, 0, 1, 1], [], []>} : vector<4x4xf32>, vector<4x16xf32>, vector<4x16xf32> -> vector<4x16xf32>
    %c0_40 = arith.constant 0 : index
    %c0_41 = arith.constant 0 : index
    %127 = vector.load %arg4[%c0_40, %c0_41] : memref<16x32xf32, #tpu.memory_space<vmem>>, vector<16x32xf32>
    %cst_42 = arith.constant dense<0.000000e+00> : vector<4x32xf32>
    %128 = tpu.matmul %116, %127, %cst_42 {dimension_numbers = #tpu.dot_dimension_numbers<[1], [0], [0], [1], [0, 0, 1, 1], [], []>} : vector<4x16xf32>, vector<16x32xf32>, vector<4x32xf32> -> vector<4x32xf32>
    %c0_43 = arith.constant 0 : index
    %c0_44 = arith.constant 0 : index
    %129 = vector.load %arg5[%c0_43, %c0_44] : memref<16x32xf32, #tpu.memory_space<vmem>>, vector<16x32xf32>
    %cst_45 = arith.constant dense<0.000000e+00> : vector<4x32xf32>
    %130 = tpu.matmul %126, %129, %cst_45 {dimension_numbers = #tpu.dot_dimension_numbers<[1], [0], [0], [1], [0, 0, 1, 1], [], []>} : vector<4x16xf32>, vector<16x32xf32>, vector<4x32xf32> -> vector<4x32xf32>
    %131 = arith.addf %128, %130 : vector<4x32xf32>
    %c0_46 = arith.constant 0 : index
    %c0_47 = arith.constant 0 : index
    %132 = vector.load %arg6[%c0_46, %c0_47] : memref<1x32xf32, #tpu.memory_space<vmem>>, vector<1x32xf32>
    %133 = vector.broadcast %132 : vector<1x32xf32> to vector<4x32xf32>
    %134 = arith.addf %131, %133 : vector<4x32xf32>
    %cst_48 = arith.constant 0.000000e+00 : f32
    %135 = vector.broadcast %cst_48 : f32 to vector<4x32xf32>
    %136 = arith.maximumf %134, %135 : vector<4x32xf32>
    %c0_49 = arith.constant 0 : index
    %c0_50 = arith.constant 0 : index
    %137 = vector.load %arg7[%c0_49, %c0_50] : memref<1x32xf32, #tpu.memory_space<vmem>>, vector<1x32xf32>
    %138 = tpu.transpose %136, [1, 0] : vector<4x32xf32> -> vector<32x4xf32>
    %cst_51 = arith.constant dense<0.000000e+00> : vector<1x4xf32>
    %139 = tpu.matmul %137, %138, %cst_51 {dimension_numbers = #tpu.dot_dimension_numbers<[1], [0], [0], [1], [0, 0, 1, 1], [], []>} : vector<1x32xf32>, vector<32x4xf32>, vector<1x4xf32> -> vector<1x4xf32>
    %c0_52 = arith.constant 0 : index
    %c0_53 = arith.constant 0 : index
    %140 = vector.load %arg8[%c0_52, %c0_53] : memref<1x1xf32, #tpu.memory_space<vmem>>, vector<1x1xf32>
    %141 = vector.broadcast %140 : vector<1x1xf32> to vector<1x4xf32>
    %142 = arith.addf %139, %141 : vector<1x4xf32>
    %143 = arith.negf %142 : vector<1x4xf32>
    %144 = math.exp %143 : vector<1x4xf32>
    %cst_54 = arith.constant 1.000000e+00 : f32
    %145 = vector.broadcast %cst_54 : f32 to vector<1x4xf32>
    %146 = arith.addf %145, %144 : vector<1x4xf32>
    %147 = arith.divf %145, %146 : vector<1x4xf32>
    %c0_55 = arith.constant 0 : index
    %c0_56 = arith.constant 0 : index
    %148 = vector.load %arg9[%c0_55, %c0_56] : memref<1x4xf32, #tpu.memory_space<vmem>>, vector<1x4xf32>
    tpu.vector_store %arg9[%c0_55, %c0_56], %147 {strides = array<i32>} : memref<1x4xf32, #tpu.memory_space<vmem>>, vector<1x4xf32>,
    return
  }
}

</mosaic_0001>

<bundles_post_ra>
// kernel: _cbilstm_forward_impl.1
= control target key start
LH: loop header
LB: loop body
LE: loop exit
PB: predicated region body
PF: predicated region fallthrough
CT: control target
= control target key end

     0   :  { %s1651_s0 = inlined_call_operand.vmem [shape: bf16[64,32], index: 0, kind: input, shape index: {}]   ;;  %s1652_s1 = inlined_call_operand.vmem [shape: bf16[32,128], index: 1, kind: input, shape index: {}]   ;;  %s1653_s2 = inlined_call_operand.vmem [shape: f32[1,128], index: 2, kind: input, shape index: {}]   ;;  %s1654_s3 = inlined_call_operand.vmem [shape: f32[32,128], index: 3, kind: input, shape index: {}]   ;;  %s1655_s4 = inlined_call_operand.vmem [shape: f32[16,32], index: 4, kind: input, shape index: {}]   ;;  %s1656_s5 = inlined_call_operand.vmem [shape: f32[16,32], index: 5, kind: input, shape index: {}]   ;;  %s1657_s6 = inlined_call_operand.vmem [shape: f32[1,32], index: 6, kind: input, shape index: {}]   ;;  %s1658_s7 = inlined_call_operand.vmem [shape: f32[1,32], index: 7, kind: input, shape index: {}]   ;;  %s1659_s8 = inlined_call_operand.<no memory space> [shape: f32[1,1], index: 8, kind: input, shape index: {}]   ;;  %s1660_s9 = inlined_call_operand.hbm [shape: f32[1,4], index: 9, kind: output, shape index: {}]  }
   0x1   :  { %v14_v0 = vstv %s1659_s8 }
   0x2   :  { %15 = vst [vmem:[#allocation4] sm:$0x1] %v14_v0 }
   0x3   :  { %v1298_v1 = vld [vmem:[%s1652_s1 + $0x8] sm:$0xff]   ;;  %v1460_v2 = vld [vmem:[%s1654_s3 + $0x18] sm:$0xff]  ;;  %v1465_v3 = vld [vmem:[%s1654_s3 + $0x10] sm:$0xff]  ;;  %vm87_vm0 = vcmask 261120   ;;  %v1394_v8 = vmov 0.0  }
   0x4   :  { %1209 = vmatprep.subr.bf16.mxu0 %v1298_v1  ;;  %1221 = vmatprep.subr.mxu1 %v1460_v2  ;;  %v1299_v4 = vld [vmem:[%s1652_s1] sm:$0xff]   ;;  %v1474_v5 = vld [vmem:[%s1654_s3 + $0x8] sm:$0xff] }
   0x5   :  { %1210 = vmatpush3.bf16.msra.mxu0 %v1298_v1  ;;  %1222 = vmatpush3.msra.mxu1 %v1460_v2  ;;  %v1480_v6 = vld [vmem:[%s1654_s3] sm:$0xff]  ;;  %v1301_v9 = vld [vmem:[%s1651_s0 + $0x8] sm:$0xff]  }
   0x6   :  { %1223 = vmatprep.subr.mxu1 %v1465_v3  ;;  %1211 = vmatprep.subr.bf16.mxu0 %v1299_v4  ;;  %v1300_v7 = vld [vmem:[%s1651_s0] sm:$0xff]  }
   0x7   :  { %1224 = vmatpush3.msra.mxu1 %v1465_v3  ;;  %1229 = vmatprep.mubr.f32.mxu1 %v1394_v8 }
   0x8   :  { %1225 = vmatprep.subr.mxu1 %v1474_v5  ;;  %1213 = vmatprep.mubr.msk.bf16.mxu0 %vm87_vm0, %v1300_v7 }
   0x9   :  { %16 = vsyncpa [#allocation6], 0  ;;  %1212 = vmatpush3.bf16.msra.mxu0 %v1299_v4  ;;  %1226 = vmatpush3.msra.mxu1 %v1474_v5  ;;  %v1521_v12 = vld [vmem:[%s1653_s2] ss:$0 sm:$0xff]  ;;  %s1395_s26 = smov 32   ;;  %s1396_s2 = smov 64  }
   0xa   :  { %1227 = vmatprep.subr.mxu1 %v1480_v6  ;;  %1243 = vmatprep.subr.mxu0 %v1460_v2  ;;  %vm307_vm1 = vcmask 785920   ;;  %vm321_vm2 = vcmask 253952   ;;  %vm1397_vm3 = vmmov 0   ;;  %s1398_s11 = smov 112   ;;  %vm795_vm5 = vcmask 1043456  }
   0xb   :  { %1228 = vmatpush3.msra.mxu1 %v1480_v6  ;;  %vm791_vm6 = vcmask 31744   ;;  %vm872_vm7 = vcmask 130048   ;;  %vm1120_vm8 = vcmask 24576  }
   0xc   :  { %1214 = vmatmul.mubr.msk.bf16.vlgmr.msra.gmra.mxu0 %vm87_vm0, %v1301_v9  ;;  %1230 = vmatmul.mubr.f32.vlgmr.msra.gmra.mxu1 %v1394_v8 }
   0xd   :  { %1232 = vmatprep.subr.mxu1 %v1460_v2  ;;  %1244 = vmatpush3.msra.mxu0 %v1460_v2 }
   0xe   :  { %1233 = vmatpush3.msra.mxu1 %v1460_v2  ;;  %1245 = vmatprep.subr.mxu0 %v1465_v3 }
   0xf   :  { %1234 = vmatprep.subr.mxu1 %v1465_v3  ;;  %1246 = vmatpush3.msra.mxu0 %v1465_v3 }
  0x10   :  { %1235 = vmatpush3.msra.mxu1 %v1465_v3  ;;  %1247 = vmatprep.subr.mxu0 %v1474_v5 }
  0x11   :  { %1236 = vmatprep.subr.mxu1 %v1474_v5  ;;  %1248 = vmatpush3.msra.mxu0 %v1474_v5 }
  0x12   :  { %1237 = vmatpush3.msra.mxu1 %v1474_v5  ;;  %1249 = vmatprep.subr.mxu0 %v1480_v6 }
  0x13   :  { %1238 = vmatprep.subr.mxu1 %v1480_v6  ;;  %1250 = vmatpush3.msra.mxu0 %v1480_v6 }
  0x14   :  { %1239 = vmatpush3.msra.mxu1 %v1480_v6  ;;  %1265 = vmatprep.subr.mxu0 %v1394_v8 }
  0x15   :  { %1254 = vmatprep.subr.mxu1 %v1460_v2 }
  0xcc   :  { %v1516_v10 = vpop.f32.mrf.mxu0  ;;  %v1231_v11 = vpop.f32.mrf.mxu1 }
  0xcd   :  { %v143_v54 = vadd.f32 %v1516_v10, %v1521_v12 }
  0xce   :  { %v134_v13 = vpop.f32.mrf.mxu0  ;;  %v248_v15 = vpop.f32.mrf.mxu1 }
  0xcf   :  { %v135_v14 = vadd.f32 %v1521_v12, %v134_v13 }
  0xd0   :  { %v1524_v16 = vpop.f32.mrf.mxu0 }
  0xd1   :  { %v257_v17 = vadd.f32 %v248_v15, %v135_v14  ;;  %v146_v52 = vadd.f32 %v1524_v16, %v1521_v12 }
  0xd2   :  { %v137_v18 = vpop.f32.mrf.mxu0 }
  0xd3   :  { %1304 = vtanh.f32 %v257_v17  ;;  %v138_v19 = vadd.f32 %v1521_v12, %v137_v18  ;;  %v1147_v23 = vmul.f32 -1.442695, %v257_v17  ;;  %v1302_v17 = vld [vmem:[%s1651_s0 + $0x10] sm:$0xff]   ;;  %v1303_v18 = vld [vmem:[%s1651_s0 + $0x18] sm:$0xff]  }
  0xd4   :  { %1217 = vmatprep.mubr.msk.bf16.mxu0 %vm87_vm0, %v1302_v17 }
  0xd5   :  { %v258_v20 = vadd.f32 %v1231_v11, %v138_v19  ;;  %1218 = vmatmul.mubr.msk.bf16.gmra.mxu0 %vm87_vm0, %v1303_v18 }
  0xd7   :  { %1306 = vtanh.f32 %v258_v20  ;;  %v1148_v24 = vmul.f32 -1.442695, %v258_v20 }
  0xd8   :  { %1308 = vpow2.f32 %v1147_v23 }
  0xd9   :  { %1310 = vpow2.f32 %v1148_v24 }
  0xe0   :  { %v1305_v21 = vpop.eup %1304 }
  0xe1   :  { %277 = vrot.lane.b32.xlu0 %v1305_v21, %s1395_s26 }
  0xe4   :  { %v1307_v22 = vpop.eup %1306 }
  0xe5   :  { %279 = vrot.lane.b32.xlu0 %v1307_v22, %s1395_s26  ;;  %v1309_v25 = vpop.eup %1308 }
  0xe6   :  { %v265_v26 = vadd.f32 1.0, %v1309_v25  ;;  %v1311_v27 = vpop.eup %1310 }
  0xe7   :  { %v266_v28 = vadd.f32 1.0, %v1311_v27 }
  0xe8   :  { %1312 = vrcp.f32 %v265_v26 }
  0xe9   :  { %1314 = vrcp.f32 %v266_v28 }
  0xf5   :  { %v1313_v29 = vpop.eup %1312 }
  0xf6   :  { %v1315_v32 = vpop.eup %1314  ;;  %v273_v35 = vmul.f32 0.0, %v1313_v29 }
  0xf7   :  { %v274_v38 = vmul.f32 0.0, %v1315_v32 }
 0x153   :  { %v278_v30 = vpop.permute.xlu0 %277 }
 0x154   :  { %v283_v31 = vmul.f32 %v1313_v29, %v278_v30 }
 0x156   :  { %287 = vrot.lane.b32.xlu1 %v283_v31, %s1395_s26 }
 0x157   :  { %v280_v33 = vpop.permute.xlu0 %279 }
 0x158   :  { %v284_v34 = vmul.f32 %v1315_v32, %v280_v33 }
 0x15a   :  { %289 = vrot.lane.b32.xlu1 %v284_v34, %s1395_s26 }
 0x1c8   :  { %v288_v36 = vpop.permute.xlu1 %287 }
 0x1c9   :  { %v1531_v37 = vadd.f32 %v288_v36, %v273_v35 }
 0x1cb   :  { %1316 = vtanh.f32 %v1531_v37 }
 0x1cc   :  { %v290_v39 = vpop.permute.xlu1 %289 }
 0x1cd   :  { %v294_v40 = vadd.f32 %v290_v39, %v274_v38 }
 0x1cf   :  { %1318 = vtanh.f32 %v294_v40 }
 0x1d8   :  { %v1317_v41 = vpop.eup %1316 }
 0x1d9   :  { %299 = vrot.lane.b32.xlu0 %v1317_v41, %s1395_s26 }
 0x1dc   :  { %v1319_v42 = vpop.eup %1318 }
 0x1dd   :  { %301 = vrot.lane.b32.xlu1 %v1319_v42, %s1395_s26 }
 0x24b   :  { %v300_v43 = vpop.permute.xlu0 %299 }
 0x24c   :  { %v305_v44 = vmul.f32 %v1313_v29, %v300_v43  ;;  %v1219_v29 = vpop.f32.mrf.mxu0 }
 0x24e   :  { %328 = vrot.lane.b32.xlu0 %v305_v44, %s1396_s2  ;;  %v308_v47 = vsel %vm307_vm1, %v305_v44, 0.0  ;;  %v150_v30 = vpop.f32.mrf.mxu0 }
 0x24f   :  { %v302_v45 = vpop.permute.xlu1 %301  ;;  %v151_v35 = vadd.f32 %v1521_v12, %v150_v30 }
 0x250   :  { %v306_v46 = vmul.f32 %v1315_v32, %v302_v45  ;;  %v1220_v31 = vpop.f32.mrf.mxu0 }
 0x252   :  { %v309_v48 = vsel %vm307_vm1, %v306_v46, 0.0  ;;  %330 = vrot.lane.b32.xlu1 %v306_v46, %s1396_s2  ;;  %v153_v32 = vpop.f32.mrf.mxu0 }
 0x253   :  { %v1540_v49 = vadd.f32 %v309_v48, %v308_v47  ;;  %v154_v33 = vadd.f32 %v1521_v12, %v153_v32 }
 0x2c0   :  { %v329_v50 = vpop.permute.xlu0 %328 }
 0x2c1   :  { %1240 = vmatprep.mubr.msk.f32.mxu1 %vm87_vm0, %v329_v50 }
 0x2c4   :  { %v331_v51 = vpop.permute.xlu1 %330 }
 0x2c5   :  { %1241 = vmatmul.mubr.msk.f32.vlgmr.msra.gmra.mxu1 %vm87_vm0, %v331_v51 }
 0x2c6   :  { %1255 = vmatpush3.msra.mxu1 %v1460_v2 }
 0x2c7   :  { %1256 = vmatprep.subr.mxu1 %v1465_v3 }
 0x2c8   :  { %1257 = vmatpush3.msra.mxu1 %v1465_v3 }
 0x2c9   :  { %1258 = vmatprep.subr.mxu1 %v1474_v5 }
 0x2ca   :  { %1259 = vmatpush3.msra.mxu1 %v1474_v5 }
 0x2cb   :  { %1260 = vmatprep.subr.mxu1 %v1480_v6 }
 0x2cc   :  { %1261 = vmatpush3.msra.mxu1 %v1480_v6 }
 0x2cd   :  { %1270 = vmatprep.subr.mxu1 %v1394_v8 }
 0x385   :  { %v1242_v53 = vpop.f32.mrf.mxu1 }
 0x386   :  { %v412_v55 = vadd.f32 %v1242_v53, %v146_v52 }
 0x387   :  { %v402_v56 = vpop.f32.mrf.mxu1 }
 0x388   :  { %1320 = vtanh.f32 %v412_v55  ;;  %v411_v57 = vadd.f32 %v402_v56, %v143_v54  ;;  %v1152_v60 = vmul.f32 -1.442695, %v412_v55 }
 0x38a   :  { %1322 = vtanh.f32 %v411_v57  ;;  %v1151_v61 = vmul.f32 -1.442695, %v411_v57 }
 0x38b   :  { %1324 = vpow2.f32 %v1152_v60 }
 0x38c   :  { %1326 = vpow2.f32 %v1151_v61 }
 0x395   :  { %v1321_v58 = vpop.eup %1320 }
 0x396   :  { %433 = vrot.lane.b32.xlu1 %v1321_v58, %s1395_s26 }
 0x397   :  { %v1323_v59 = vpop.eup %1322 }
 0x398   :  { %431 = vrot.lane.b32.xlu0 %v1323_v59, %s1395_s26  ;;  %v1325_v62 = vpop.eup %1324 }
 0x399   :  { %v1327_v63 = vpop.eup %1326  ;;  %v420_v0 = vadd.f32 1.0, %v1325_v62 }
 0x39a   :  { %v419_v1 = vadd.f32 1.0, %v1327_v63 }
 0x39b   :  { %1328 = vrcp.f32 %v420_v0 }
 0x39c   :  { %1330 = vrcp.f32 %v419_v1 }
 0x3a8   :  { %v1329_v2 = vpop.eup %1328 }
 0x3a9   :  { %v1331_v5 = vpop.eup %1330  ;;  %v428_v9 = vmul.f32 %v1329_v2, %v294_v40 }
 0x3aa   :  { %v427_v13 = vmul.f32 %v1331_v5, %v1531_v37 }
 0x408   :  { %v434_v3 = vpop.permute.xlu1 %433 }
 0x409   :  { %v438_v4 = vmul.f32 %v1329_v2, %v434_v3 }
 0x40a   :  { %v432_v6 = vpop.permute.xlu0 %431 }
 0x40b   :  { %443 = vrot.lane.b32.xlu1 %v438_v4, %s1395_s26  ;;  %v437_v7 = vmul.f32 %v1331_v5, %v432_v6 }
 0x40d   :  { %441 = vrot.lane.b32.xlu0 %v437_v7, %s1395_s26  ;;  %v162_v7 = vadd.f32 %v1220_v31, %v1521_v12 }
 0x47d   :  { %v444_v10 = vpop.permute.xlu1 %443 }
 0x47e   :  { %v448_v11 = vadd.f32 %v444_v10, %v428_v9  ;;  %v159_v10 = vadd.f32 %v1219_v29, %v1521_v12 }
 0x47f   :  { %v442_v14 = vpop.permute.xlu0 %441 }
 0x480   :  { %1332 = vtanh.f32 %v448_v11  ;;  %v447_v15 = vadd.f32 %v442_v14, %v427_v13 }
 0x482   :  { %1334 = vtanh.f32 %v447_v15 }
 0x48d   :  { %v1333_v16 = vpop.eup %1332 }
 0x48e   :  { %455 = vrot.lane.b32.xlu1 %v1333_v16, %s1395_s26 }
 0x48f   :  { %v1335_v19 = vpop.eup %1334 }
 0x490   :  { %453 = vrot.lane.b32.xlu0 %v1335_v19, %s1395_s26 }
 0x500   :  { %v456_v20 = vpop.permute.xlu1 %455 }
 0x501   :  { %v460_v21 = vmul.f32 %v1329_v2, %v456_v20 }
 0x502   :  { %v454_v22 = vpop.permute.xlu0 %453 }
 0x503   :  { %482 = vrot.lane.b32.xlu1 %v460_v21, %s1396_s2  ;;  %v459_v23 = vmul.f32 %v1331_v5, %v454_v22  ;;  %v462_v24 = vsel %vm307_vm1, %v460_v21, 0.0 }
 0x505   :  { %v461_v25 = vsel %vm307_vm1, %v459_v23, 0.0  ;;  %480 = vrot.lane.b32.xlu0 %v459_v23, %s1396_s2 }
 0x506   :  { %v1575_v26 = vadd.f32 %v462_v24, %v461_v25 }
 0x508   :  { %v464_v29 = vrot.slane %v1575_v26, 4 }
 0x575   :  { %v483_v28 = vpop.permute.xlu1 %482 }
 0x577   :  { %v481_v27 = vpop.permute.xlu0 %480 }
 0x578   :  { %1251 = vmatprep.mubr.msk.f32.mxu0 %vm87_vm0, %v481_v27 }
 0x579   :  { %1252 = vmatmul.mubr.msk.f32.vlgmr.msra.gmra.mxu0 %vm87_vm0, %v483_v28 }
 0x57a   :  { %1267 = vmatprep.mubr.msk.f32.mxu0 %vm1397_vm3, %v1394_v8 }
 0x639   :  { %v1253_v34 = vpop.f32.mrf.mxu0 }
 0x63a   :  { %v564_v36 = vadd.f32 %v1253_v34, %v154_v33  ;;  %v311_v33 = vrot.slane %v1540_v49, 4 }
 0x63b   :  { %v554_v37 = vpop.f32.mrf.mxu0 }
 0x63c   :  { %1336 = vtanh.f32 %v564_v36  ;;  %v563_v38 = vadd.f32 %v554_v37, %v151_v35  ;;  %v1156_v41 = vmul.f32 -1.442695, %v564_v36  ;;  %v465_v35 = vadd.f32 %v464_v29, %v1575_v26 }
 0x63e   :  { %1338 = vtanh.f32 %v563_v38  ;;  %v1155_v42 = vmul.f32 -1.442695, %v563_v38  ;;  %v312_v38 = vadd.f32 %v311_v33, %v1540_v49 }
 0x63f   :  { %1340 = vpow2.f32 %v1156_v41 }
 0x640   :  { %1342 = vpow2.f32 %v1155_v42  ;;  %v313_v41 = vrot.slane %v312_v38, 2 }
 0x649   :  { %v1337_v39 = vpop.eup %1336 }
 0x64a   :  { %585 = vrot.lane.b32.xlu1 %v1337_v39, %s1395_s26 }
 0x64b   :  { %v1339_v40 = vpop.eup %1338 }
 0x64c   :  { %583 = vrot.lane.b32.xlu0 %v1339_v40, %s1395_s26  ;;  %v1341_v43 = vpop.eup %1340  ;;  %v466_v40 = vrot.slane %v465_v35, 2 }
 0x64d   :  { %v1343_v44 = vpop.eup %1342  ;;  %v572_v45 = vadd.f32 1.0, %v1341_v43 }
 0x64e   :  { %v571_v46 = vadd.f32 1.0, %v1343_v44  ;;  %v467_v43 = vadd.f32 %v466_v40, %v465_v35 }
 0x64f   :  { %1344 = vrcp.f32 %v572_v45  ;;  %v314_v45 = vadd.f32 %v313_v41, %v312_v38 }
 0x650   :  { %1346 = vrcp.f32 %v571_v46  ;;  %v468_v46 = vrot.slane %v467_v43, 1 }
 0x65c   :  { %v1345_v47 = vpop.eup %1344 }
 0x65d   :  { %v1347_v51 = vpop.eup %1346  ;;  %v580_v54 = vmul.f32 %v1345_v47, %v448_v11 }
 0x65e   :  { %v579_v57 = vmul.f32 %v1347_v51, %v447_v15 }
 0x6bc   :  { %v586_v48 = vpop.permute.xlu1 %585 }
 0x6bd   :  { %v590_v50 = vmul.f32 %v1345_v47, %v586_v48  ;;  %v315_v48 = vrot.slane %v314_v45, 1 }
 0x6be   :  { %v584_v52 = vpop.permute.xlu0 %583 }
 0x6bf   :  { %595 = vrot.lane.b32.xlu1 %v590_v50, %s1395_s26  ;;  %v589_v53 = vmul.f32 %v1347_v51, %v584_v52  ;;  %v316_v49 = vadd.f32 %v315_v48, %v314_v45 }
 0x6c1   :  { %593 = vrot.lane.b32.xlu0 %v589_v53, %s1395_s26 }
 0x731   :  { %v596_v55 = vpop.permute.xlu1 %595 }
 0x732   :  { %v600_v56 = vadd.f32 %v596_v55, %v580_v54 }
 0x733   :  { %v594_v58 = vpop.permute.xlu0 %593 }
 0x734   :  { %1348 = vtanh.f32 %v600_v56  ;;  %v599_v59 = vadd.f32 %v594_v58, %v579_v57 }
 0x736   :  { %1350 = vtanh.f32 %v599_v59 }
 0x741   :  { %v1349_v60 = vpop.eup %1348 }
 0x742   :  { %607 = vrot.lane.b32.xlu1 %v1349_v60, %s1395_s26 }
 0x743   :  { %v1351_v61 = vpop.eup %1350 }
 0x744   :  { %605 = vrot.lane.b32.xlu0 %v1351_v61, %s1395_s26 }
 0x7b4   :  { %v608_v62 = vpop.permute.xlu1 %607 }
 0x7b5   :  { %v612_v63 = vmul.f32 %v1345_v47, %v608_v62 }
 0x7b6   :  { %v606_v0 = vpop.permute.xlu0 %605 }
 0x7b7   :  { %634 = vrot.lane.b32.xlu1 %v612_v63, %s1396_s2  ;;  %v611_v1 = vmul.f32 %v1347_v51, %v606_v0  ;;  %v614_v2 = vsel %vm307_vm1, %v612_v63, 0.0  ;;  %v469_v51 = vadd.f32 %v468_v46, %v467_v43 }
 0x7b9   :  { %v613_v3 = vsel %vm307_vm1, %v611_v1, 0.0  ;;  %632 = vrot.lane.b32.xlu0 %v611_v1, %s1396_s2 }
 0x7ba   :  { %v615_v4 = vadd.f32 %v614_v2, %v613_v3 }
 0x7bc   :  { %v616_v39 = vrot.slane %v615_v4, 4 }
 0x7be   :  { %v617_v42 = vadd.f32 %v616_v39, %v615_v4 }
 0x7c0   :  { %v618_v44 = vrot.slane %v617_v42, 2 }
 0x7c2   :  { %v619_v50 = vadd.f32 %v618_v44, %v617_v42 }
 0x7c4   :  { %v620_v52 = vrot.slane %v619_v50, 1 }
 0x7c6   :  { %v621_v53 = vadd.f32 %v620_v52, %v619_v50 }
 0x829   :  { %v635_v6 = vpop.permute.xlu1 %634 }
 0x82b   :  { %v633_v5 = vpop.permute.xlu0 %632 }
 0x82c   :  { %1262 = vmatprep.mubr.msk.f32.mxu1 %vm87_vm0, %v633_v5 }
 0x82d   :  { %1263 = vmatmul.mubr.msk.f32.vlgmr.msra.gmra.mxu1 %vm87_vm0, %v635_v6 }
 0x82e   :  { %1274 = vmatprep.mubr.msk.f32.mxu1 %vm1397_vm3, %v1394_v8 }
 0x8ed   :  { %v1264_v9 = vpop.f32.mrf.mxu1 }
 0x8ee   :  { %v716_v11 = vadd.f32 %v1264_v9, %v162_v7  ;;  %v871_v7 = vld [vmem:[%s1656_s5 + $0x8] sm:$0xff] }
 0x8ef   :  { %v706_v13 = vpop.f32.mrf.mxu1  ;;  %1271 = vmatpush3.msra.mxu1 %v871_v7 }
 0x8f0   :  { %1352 = vtanh.f32 %v716_v11  ;;  %v715_v14 = vadd.f32 %v706_v13, %v159_v10  ;;  %v1160_v17 = vmul.f32 -1.442695, %v716_v11  ;;  %1272 = vmatprep.subr.mxu1 %v1394_v8  ;;  %v781_v11 = vlaneseq }
 0x8f2   :  { %1354 = vtanh.f32 %v715_v14  ;;  %v1159_v18 = vmul.f32 -1.442695, %v715_v14  ;;  %v782_v13 = vshrl.u32 %v781_v11, 7  ;;  %v784_v14 = vand.u32 127, %v781_v11 }
 0x8f3   :  { %1356 = vpow2.f32 %v1160_v17 }
 0x8f4   :  { %1358 = vpow2.f32 %v1159_v18  ;;  %v869_v18 = vld [vmem:[%s1655_s4 + $0x8] sm:$0xff]  ;;  %v1036_v33 = vsub.s32 0, %v782_v13 }
 0x8fd   :  { %v1353_v15 = vpop.eup %1352 }
 0x8fe   :  { %737 = vrot.lane.b32.xlu1 %v1353_v15, %s1395_s26  ;;  %v785_v15 = vadd.s32 %v784_v14, %v782_v13 }
 0x8ff   :  { %v1355_v16 = vpop.eup %1354 }
 0x900   :  { %735 = vrot.lane.b32.xlu0 %v1355_v16, %s1395_s26  ;;  %v1357_v19 = vpop.eup %1356  ;;  %vm786_vm4 = vcmp.eq.s32.totalorder %v785_v15, 3 }
 0x901   :  { %v1359_v20 = vpop.eup %1358  ;;  %v724_v21 = vadd.f32 1.0, %v1357_v19  ;;  %v787_v16 = vsel %vm786_vm4, 1.0, %v1394_v8  ;;  %v868_v19 = vld [vmem:[%s1655_s4] sm:$0xff] }
 0x902   :  { %v723_v22 = vadd.f32 1.0, %v1359_v20  ;;  %v870_v20 = vld [vmem:[%s1656_s5] sm:$0xff] }
 0x903   :  { %1360 = vrcp.f32 %v724_v21  ;;  %1273 = vmatpush3.msra.mxu1 %v870_v20 }
 0x904   :  { %1362 = vrcp.f32 %v723_v22  ;;  %1284 = vmatprep.subr.mxu1 %v1394_v8 }
 0x910   :  { %v1361_v12 = vpop.eup %1360 }
 0x911   :  { %v1363_v25 = vpop.eup %1362  ;;  %v732_v30 = vmul.f32 %v1361_v12, %v600_v56 }
 0x912   :  { %v731_v34 = vmul.f32 %v1363_v25, %v599_v59 }
 0x970   :  { %v738_v23 = vpop.permute.xlu1 %737 }
 0x971   :  { %v742_v24 = vmul.f32 %v1361_v12, %v738_v23 }
 0x972   :  { %v736_v27 = vpop.permute.xlu0 %735 }
 0x973   :  { %747 = vrot.lane.b32.xlu1 %v742_v24, %s1395_s26  ;;  %v741_v28 = vmul.f32 %v1363_v25, %v736_v27  ;;  %v1028_v24 = vld [vmem:[#allocation4] sm:$0x1] }
 0x975   :  { %745 = vrot.lane.b32.xlu0 %v741_v28, %s1395_s26  ;;  %v1165_v28 = vld [vmem:[%s1657_s6] ss:$0 sm:$0xff]  ;;  %s1400_s6 = smov [#allocation5]  }
 0x976   :  { %s1128_s19 = sshll.u32 %s1400_s6, 4  ;;  %s1129_s19 = int_to_ptr.vmem [resolvable:$true] %s1128_s19 }
 0x977   :  { %s1376_s20 = scalar_lea.vmem %s1129_s19, 32  ;;  %p1377_p1 = scmp.lt.s32.totalorder %s1129_s19, %s1129_s19 }
 0x9e5   :  { %v748_v31 = vpop.permute.xlu1 %747 }
 0x9e6   :  { %v752_v32 = vadd.f32 %v748_v31, %v732_v30 }
 0x9e7   :  { %v746_v36 = vpop.permute.xlu0 %745 }
 0x9e8   :  { %1364 = vtanh.f32 %v752_v32  ;;  %v751_v37 = vadd.f32 %v746_v36, %v731_v34 }
 0x9ea   :  { %1366 = vtanh.f32 %v751_v37 }
 0x9f5   :  { %v1365_v47 = vpop.eup %1364 }
 0x9f6   :  { %759 = vrot.lane.b32.xlu1 %v1365_v47, %s1395_s26 }
 0x9f7   :  { %v1367_v26 = vpop.eup %1366 }
 0x9f8   :  { %757 = vrot.lane.b32.xlu0 %v1367_v26, %s1395_s26 }
 0x9fa   :  { %471 = vrot.lane.b32.xlu1 %v469_v51, %s1396_s2 }
 0x9fc   :  { %318 = vrot.lane.b32.xlu0 %v316_v49, %s1396_s2 }
 0xa00   :  { %623 = vrot.lane.b32.xlu0 %v621_v53, %s1396_s2 }
 0xa68   :  { %v760_v54 = vpop.permute.xlu1 %759 }
 0xa69   :  { %v764_v55 = vmul.f32 %v1361_v12, %v760_v54 }
 0xa6a   :  { %v758_v56 = vpop.permute.xlu0 %757 }
 0xa6b   :  { %v763_v57 = vmul.f32 %v1363_v25, %v758_v56  ;;  %v766_v59 = vsel %vm307_vm1, %v764_v55, 0.0  ;;  %v1399_v25 = vmov 0  }
 0xa6c   :  { %v472_v58 = vpop.permute.xlu1 %471  ;;  %1296 = vset.pattern.permute.xlu1 %v1399_v25  ;;  %1297 = vset.pattern.permute.xlu0 %v1399_v25 }
 0xa6d   :  { %474 = vst.msk [vmem:[#allocation3 + $0x1] sm:$0x1] %vm321_vm2, %v472_v58  ;;  %v765_v60 = vsel %vm307_vm1, %v763_v57, 0.0 }
 0xa6e   :  { %v767_v61 = vadd.f32 %v766_v59, %v765_v60  ;;  %v319_v62 = vpop.permute.xlu0 %318 }
 0xa6f   :  { %322 = vst.msk [vmem:[#allocation3] sm:$0x1] %vm321_vm2, %v319_v62 }
 0xa70   :  { %v768_v63 = vrot.slane %v767_v61, 4 }
 0xa72   :  { %v769_v0 = vadd.f32 %v768_v63, %v767_v61  ;;  %v624_v1 = vpop.permute.xlu0 %623 }
 0xa73   :  { %626 = vst.msk [vmem:[#allocation3 + $0x2] sm:$0x1] %vm321_vm2, %v624_v1 }
 0xa74   :  { %v770_v2 = vrot.slane %v769_v0, 2 }
 0xa76   :  { %v771_v3 = vadd.f32 %v770_v2, %v769_v0 }
 0xa78   :  { %v772_v4 = vrot.slane %v771_v3, 1 }
 0xa7a   :  { %v773_v5 = vadd.f32 %v772_v4, %v771_v3 }
 0xa7c   :  { %775 = vrot.lane.b32.xlu1 %v773_v5, %s1396_s2 }
 0xa80   :  { %1031 = vperm.xlu1 %1296, %v1028_v24  }
 0xaee   :  { %v776_v6 = vpop.permute.xlu1 %775 }
 0xaef   :  { %778 = vst.msk [vmem:[#allocation3 + $0x3] sm:$0x1] %vm321_vm2, %v776_v6 }
 0xaf6   :  { %v779_v9 = vld [vmem:[#allocation3] sm:$0xf] }
 0xaf7   :  { %v780_v10 = vmul.f32 0.0625, %v779_v9 }
 0xaf9   :  { %789 = vrot.lane.b32.xlu0 %v780_v10, %s1398_s11 }
 0xafb   :  { %v1032_v34 = vpop.permute.xlu1 %1031 }
 0xafc   :  { %v1037_v35 = vrot.slane %v1032_v34, %v1036_v33 }
 0xb6b   :  { %v790_v17 = vpop.permute.xlu0 %789 }
 0xb6c   :  { %1266 = vmatpush3.msk.msra.mxu0 %vm795_vm5, %v790_v17 }
 0xb6d   :  { %1268 = vmatmul.mubr.msk.f32.vlgmr.msra.gmra.mxu0 %vm791_vm6, %v787_v16  ;;  %1277 = vmatprep.subr.mxu0 %v1394_v8 }
 0xb6e   :  { %1278 = vmatpush3.msra.mxu0 %v869_v18  ;;  %1281 = vmatprep.mubr.msk.f32.mxu0 %vm1397_vm3, %v1394_v8 }
 0xb6f   :  { %1279 = vmatprep.subr.mxu0 %v1394_v8 }
 0xb70   :  { %1280 = vmatpush3.msra.mxu0 %v868_v19 }
 0xb71   :  { %1282 = vmatmul.mubr.msk.f32.vlgmr.msra.gmra.mxu0 %vm872_vm7, %v780_v10 }
 0xc2d   :  { %v864_v21 = vpop.f32.mrf.mxu0 }
 0xc2e   :  { %1275 = vmatmul.mubr.msk.f32.vlgmr.msra.gmra.mxu1 %vm872_vm7, %v864_v21 }
 0xc2f   :  { %v1269_v22 = vpop.f32.mrf.mxu0  ;;  %1286 = vmatprep.mubr.msk.f32.mxu1 %vm1397_vm3, %v1394_v8  ;;  %v1027_v8 = vld [vmem:[%s1658_s7] sm:$0x1]  ;;  %s1372_s7 = scalar_lea.vmem %s1129_s19, 16 }
 0xc30   :  { %p1373_p0 = scmp.ne.s32.totalorder %s1129_s19, %s1372_s7  ;;  %p1378_p2 = scmp.lt.s32.totalorder %s1376_s20, %s1372_s7 }
 0xc31   :  { %v1014_v12 = vpop.f32.mrf.mxu0 }
 0xc32   :  { %p1379_p3 = por %p1378_p2, %p1377_p1 }
 0xc33   :  { %v1283_v23 = vpop.f32.mrf.mxu0 }
 0xc34   :  { %p1380_p4 = pnand %p1379_p3, %p1373_p0 }
 0xcee   :  { %v942_v27 = vpop.f32.mrf.mxu1 }
 0xcef   :  { %v1015_v29 = vadd.f32 %v1014_v12, %v942_v27 }
 0xcf0   :  { %v1276_v30 = vpop.f32.mrf.mxu1 }
 0xcf1   :  { %v1025_v31 = vadd.f32 %v1165_v28, %v1015_v29 }
 0xcf3   :  { %v1026_v32 = vmax.f32 %v1025_v31, 0.0 }
 0xcf5   :  { %1285 = vmatpush3.xpose.msk.msra.mxu1 %vm87_vm0, %v1026_v32 }
 0xcf8   :  { %1287 = vmatmul.mubr.msk.f32.vlgmr.msra.gmra.mxu1 %vm87_vm0, %v1027_v8 }
 0xdb8   :  { %v1110_v36 = vpop.f32.mrf.mxu1 }
 0xdb9   :  { %v1111_v37 = vadd.f32 %v1110_v36, %v1037_v35 }
 0xdba   :  { %v1288_v38 = vpop.f32.mrf.mxu1 }
 0xdbb   :  { %v1168_v39 = vmul.f32 -1.442695, %v1111_v37 }
 0xdbd   :  { %1368 = vpow2.f32 %v1168_v39 }
 0xdca   :  { %v1369_v40 = vpop.eup %1368 }
 0xdcb   :  { %v1117_v41 = vadd.f32 1.0, %v1369_v40 }
 0xdcd   :  { %1370 = vrcp.f32 %v1117_v41 }
 0xdda   :  { %v1371_v42 = vpop.eup %1370 }
 0xddb   :  { %1121 = vst.msk [vmem:[#allocation5] sm:$0x1] %vm1120_vm8, %v1371_v42 }
 0xddc   :  { %1383 = shalt.err (!%p1380_p4)
}
 0xddd   :  { %1131 = dma.vmem_to_hbm [thread:$0]  %s1129_s19, 16, %s1660_s9, [#allocation6]  }
 0xdde   :  { %1392 = dma.done.wait [#allocation6], 16  }
 0xddf   :  { %1393 = vsyncadd [#allocation6], 4294967280 }
 0xde0   :  { %1135 = vsyncpa [#allocation6], 1 }

</bundles_post_ra>
